<compile_context>
chip_gen: v5e
topology: v5e:2x2
jax: 0.10.0
libtpu: 0.0.40
codegen_flags: <defaults>
</compile_context>

<pallas_src>
import math

import jax
import jax.numpy as jnp
from jax import lax
from jax.experimental import pallas as pl
from jax.experimental.pallas import tpu as pltpu

# ---- small, deterministic problem size (consistent with the module) ----
B = 2            # batch
N = 8            # seq_len
D = 32           # d_model (dim)
H = 4            # n_heads
DH = D // H      # head dim
MLP_RATIO = 4.0
DM = int(D * MLP_RATIO)   # MLP hidden dim = 128
LN_EPS = 1e-5
_SQRT2 = 1.4142135623730951


def _erf_inkernel(x):
    # Abramowitz & Stegun 7.1.26, |error| < 1.5e-7. exp -> EUP, polynomial -> VPU.
    a1, a2, a3, a4, a5 = 0.254829592, -0.284496736, 1.421413741, -1.453152027, 1.061405429
    p = 0.3275911
    s = jnp.where(x >= 0.0, 1.0, -1.0)
    z = jnp.abs(x)
    t = 1.0 / (1.0 + p * z)
    poly = ((((a5 * t + a4) * t + a3) * t + a2) * t + a1) * t
    return s * (1.0 - poly * jnp.exp(-z * z))


def _gelu_exact_ref(x):
    # exact GELU (matches torch.nn.GELU() default): 0.5*x*(1+erf(x/sqrt(2)))
    return 0.5 * x * (1.0 + jax.scipy.special.erf(x / _SQRT2))


# ----------------------------- Pallas kernel -----------------------------
def spectre_block_kernel(x_ref, m_ref, s_ref, bmix_ref, w1_ref, bfc1_ref, w2_ref, o_ref):
    # x_ref:    (B*N, D)    f32   token rows
    # m_ref:    (H, D, D)   bf16  per-head Wv_h @ Wo_h, rows pre-scaled by gamma1
    # s_ref:    (H, B*N, B*N) bf16 per-head batch-block-diag spectral-mix matrices
    # bmix_ref: (B*N, D)    f32   mixer bias from beta1 (mixer is linear)
    # w1_ref:   (D, DM)     bf16  fc1 weights, rows pre-scaled by gamma2
    # bfc1_ref: (1, DM)     f32   beta2 @ W1 (pre-GELU bias)
    # w2_ref:   (DM, D)     bf16  fc2 weights
    x = x_ref[...]                                            # (BN, D) f32

    def ln_normalize(h):
        # Per-token LayerNorm stats over D on the VPU (two-pass, cancellation-safe).
        mu = jnp.mean(h, axis=-1, keepdims=True)
        c = h - mu
        var = jnp.mean(c * c, axis=-1, keepdims=True)
        return c * lax.rsqrt(var + LN_EPS)

    # ---- norm1 (affine folded into m_ref / bmix_ref) + SPECTRE mixer ----
    hn = ln_normalize(x).astype(jnp.bfloat16)                 # (BN, D)
    mix = bmix_ref[...]                                       # (BN, D) f32
    for hh in range(H):                                       # unrolled, H = 4
        ph = jnp.dot(hn, m_ref[hh],
                     preferred_element_type=jnp.float32)      # (BN, D) channel mix
        mix = mix + jnp.dot(s_ref[hh], ph.astype(jnp.bfloat16),
                            preferred_element_type=jnp.float32)  # seq (spectral) mix
    x = x + mix                                               # DropPath = identity (eval)

    # ---- norm2 (affine folded into w1_ref / bfc1_ref) + MLP ----
    h2 = ln_normalize(x).astype(jnp.bfloat16)                 # (BN, D)
    g = jnp.dot(h2, w1_ref[...],
                preferred_element_type=jnp.float32) + bfc1_ref[...]     # (BN, DM)
    g = 0.5 * g * (1.0 + _erf_inkernel(g * (1.0 / _SQRT2)))   # exact GELU
    ff = jnp.dot(g.astype(jnp.bfloat16), w2_ref[...],
                 preferred_element_type=jnp.float32)          # (BN, D)
    o_ref[...] = (x + ff).astype(o_ref.dtype)                 # Dropout/DropPath = identity


# ----------------------------- wrapper -----------------------------------
def spectre_block(x, m, s, bmix, w1g, bfc1, w2):
    Bx, Nx, Dx = x.shape
    BN = Bx * Nx
    xr = x.reshape(BN, Dx)                                    # token-row layout

    weights = (m, s, bmix, w1g, bfc1, w2)
    flops = 2 * BN * (H * (Dx * Dx + BN * Dx) + 2 * Dx * DM) + 12 * BN * Dx
    transcendentals = 2 * BN * DM + 2 * BN                    # exp + recip (GELU), rsqrt
    bytes_accessed = (2 * xr.size * xr.dtype.itemsize
                      + sum(int(w.size) * w.dtype.itemsize for w in weights))

    vmem = pl.BlockSpec(memory_space=pltpu.MemorySpace.VMEM)  # whole array, VMEM resident
    out = pl.pallas_call(
        spectre_block_kernel,
        out_shape=jax.ShapeDtypeStruct((BN, Dx), x.dtype),
        in_specs=[vmem] * 7,
        out_specs=vmem,
        cost_estimate=pl.CostEstimate(flops=flops,
                                      transcendentals=transcendentals,
                                      bytes_accessed=bytes_accessed),
    )(xr, m, s, bmix, w1g, bfc1, w2)
    return out.reshape(Bx, Nx, Dx)


# --------------------- deterministic parameter setup ----------------------
def init_params(key):
    ks = jax.random.split(key, 10)
    # LayerNorm affine params randomized so the folded kernel path is exercised.
    g1 = 1.0 + 0.1 * jax.random.normal(ks[0], (D,), jnp.float32)
    b1 = 0.1 * jax.random.normal(ks[1], (D,), jnp.float32)
    g2 = 1.0 + 0.1 * jax.random.normal(ks[2], (D,), jnp.float32)
    b2 = 0.1 * jax.random.normal(ks[3], (D,), jnp.float32)
    # Linear weights stored as (in, out) so x @ W applies directly.
    wv = jax.random.normal(ks[4], (D, D), jnp.float32) / math.sqrt(D)
    wo = jax.random.normal(ks[5], (D, D), jnp.float32) / math.sqrt(D)
    w1 = jax.random.normal(ks[6], (D, DM), jnp.float32) / math.sqrt(D)
    w2 = jax.random.normal(ks[7], (DM, D), jnp.float32) / math.sqrt(DM)
    # learned complex spectral filter per head per rFFT frequency
    F = N // 2 + 1
    filt_r = 1.0 + 0.1 * jax.random.normal(ks[8], (H, F), jnp.float32)
    filt_i = 0.1 * jax.random.normal(ks[9], (H, F), jnp.float32)
    return g1, b1, g2, b2, wv, wo, w1, w2, filt_r, filt_i


def fold_params(g1, b1, g2, b2, wv, wo, w1, w2, filt_r, filt_i):
    """Precompute the kernel's operators (done once; all exact up to bf16 storage)."""
    hi = lax.Precision.HIGHEST
    filt = filt_r + 1j * filt_i                                   # (H, F)

    # Per-head real (N, N) spectral-mix operator: irfft(diag(filt_h) . rfft(.)).
    eye_n = jnp.eye(N, dtype=jnp.float32)
    def spec_mat(f_h):
        y = jnp.fft.rfft(eye_n, axis=0) * f_h[:, None]            # (F, N)
        return jnp.fft.irfft(y, n=N, axis=0)                      # (N, N); cols = S @ e_j
    S = jax.vmap(spec_mat)(filt)                                  # (H, N, N)

    # Per-head folded channel mixer M_h = Wv[:, h] @ Wo[h, :]  (D, D).
    wv_h = wv.reshape(D, H, DH).transpose(1, 0, 2)                # (H, D, DH)
    wo_h = wo.reshape(H, DH, D)                                   # (H, DH, D)
    M = jnp.einsum("hdk,hke->hde", wv_h, wo_h, precision=hi)      # (H, D, D)

    # Fold the norm1 affine: gamma1 scales M_h rows; beta1 -> additive mixer bias
    # (the mixer is linear):  bias = sum_h S_h @ (1 . (b1 @ M_h)).
    Mg = M * g1[None, :, None]                                    # (H, D, D)
    b1M = jnp.einsum("d,hde->he", b1, M, precision=hi)            # (H, D)
    srow = S.sum(axis=2)                                          # (H, N) = S_h @ ones
    bias_nd = jnp.einsum("hn,he->ne", srow, b1M, precision=hi)    # (N, D)
    bmix = jnp.tile(bias_nd, (B, 1))                              # (B*N, D)

    # Batch-block-diagonal seq mixers so the whole kernel stays in (B*N, D) rows.
    Sbd = jnp.stack([jnp.kron(jnp.eye(B, dtype=jnp.float32), S[h]) for h in range(H)])

    # Fold the norm2 affine into fc1.
    w1g = w1 * g2[:, None]                                        # (D, DM)
    bfc1 = jnp.einsum("d,dm->m", b2, w1, precision=hi)[None, :]   # (1, DM)

    return (Mg.astype(jnp.bfloat16), Sbd.astype(jnp.bfloat16),
            bmix.astype(jnp.float32),
            w1g.astype(jnp.bfloat16), bfc1.astype(jnp.float32),
            w2.astype(jnp.bfloat16))


# --------------------------- pure-JAX reference ---------------------------
def spectre_block_ref(x, g1, b1, g2, b2, wv, wo, w1, w2, filt_r, filt_i):
    hi = lax.Precision.HIGHEST

    def ln(h, w, b):
        mu = h.mean(-1, keepdims=True)
        var = ((h - mu) ** 2).mean(-1, keepdims=True)
        return (h - mu) / jnp.sqrt(var + LN_EPS) * w + b

    h = ln(x, g1, b1)
    v = jnp.einsum("bnd,de->bne", h, wv, precision=hi).reshape(B, N, H, DH)
    vhat = jnp.fft.rfft(v, axis=1)                                # (B, F, H, DH)
    filt = (filt_r + 1j * filt_i).T                               # (F, H)
    vhat = vhat * filt[None, :, :, None]
    v = jnp.fft.irfft(vhat, n=N, axis=1).reshape(B, N, D)
    x = x + jnp.einsum("bnd,de->bne", v, wo, precision=hi)
    h2 = ln(x, g2, b2)
    g = _gelu_exact_ref(jnp.einsum("bnd,dm->bnm", h2, w1, precision=hi))
    return x + jnp.einsum("bnm,md->bnd", g, w2, precision=hi)


# --------------------------------- main -----------------------------------
if __name__ == "__main__":
    key = jax.random.PRNGKey(0)
    kx, kp = jax.random.split(key)
    x = jax.random.normal(kx, (B, N, D), jnp.float32)

    params = init_params(kp)
    g1, b1, g2, b2, wv, wo, w1, w2, filt_r, filt_i = params
    folded = fold_params(*params)

    out = jax.block_until_ready(spectre_block(x, *folded))
    ref = jax.block_until_ready(
        spectre_block_ref(x, g1, b1, g2, b2, wv, wo, w1, w2, filt_r, filt_i))

    assert out.shape == x.shape and out.dtype == x.dtype
    # Tolerance covers the bf16 MXU weights/activations vs the f32 HIGHEST-precision
    # FFT-based reference; observed error is well inside this.
    assert bool(jnp.allclose(out, ref, rtol=5e-2, atol=5e-2))
    print("KERNEL_OK")
</pallas_src>

<mosaic_0001>
module attributes {stable_mosaic.version = 11 : i64} {
  func.func @spectre_block_kernel(%arg0: memref<16x32xf32, #tpu.memory_space<vmem>>, %arg1: memref<4x32x32xbf16, #tpu.memory_space<vmem>>, %arg2: memref<4x16x16xbf16, #tpu.memory_space<vmem>>, %arg3: memref<16x32xf32, #tpu.memory_space<vmem>>, %arg4: memref<32x128xbf16, #tpu.memory_space<vmem>>, %arg5: memref<1x128xf32, #tpu.memory_space<vmem>>, %arg6: memref<128x32xbf16, #tpu.memory_space<vmem>>, %arg7: memref<16x32xf32, #tpu.memory_space<vmem>>) attributes {dimension_semantics = [], scalar_prefetch = 0 : i64, scratch_operands = 0 : i64, tpu.core_type = #tpu.core_type<tc>} {
    %c0 = arith.constant 0 : index
    %c0_0 = arith.constant 0 : index
    %0 = vector.load %arg0[%c0, %c0_0] : memref<16x32xf32, #tpu.memory_space<vmem>>, vector<16x32xf32>
    %cst = arith.constant dense<0.000000e+00> : vector<16xf32>
    %1 = vector.multi_reduction <add>, %0, %cst [1] : vector<16x32xf32> to vector<16xf32>
    %2 = vector.shape_cast %1 : vector<16xf32> to vector<16x1xf32>
    %cst_1 = arith.constant 3.200000e+01 : f32
    %3 = vector.broadcast %cst_1 : f32 to vector<16x1xf32>
    %4 = arith.divf %2, %3 : vector<16x1xf32>
    %5 = vector.broadcast %4 : vector<16x1xf32> to vector<16x32xf32>
    %6 = arith.subf %0, %5 : vector<16x32xf32>
    %7 = arith.mulf %6, %6 : vector<16x32xf32>
    %cst_2 = arith.constant dense<0.000000e+00> : vector<16xf32>
    %8 = vector.multi_reduction <add>, %7, %cst_2 [1] : vector<16x32xf32> to vector<16xf32>
    %9 = vector.shape_cast %8 : vector<16xf32> to vector<16x1xf32>
    %cst_3 = arith.constant 3.200000e+01 : f32
    %10 = vector.broadcast %cst_3 : f32 to vector<16x1xf32>
    %11 = arith.divf %9, %10 : vector<16x1xf32>
    %cst_4 = arith.constant 9.99999974E-6 : f32
    %12 = vector.broadcast %cst_4 : f32 to vector<16x1xf32>
    %13 = arith.addf %11, %12 : vector<16x1xf32>
    %14 = math.rsqrt %13 : vector<16x1xf32>
    %15 = vector.broadcast %14 : vector<16x1xf32> to vector<16x32xf32>
    %16 = arith.mulf %6, %15 : vector<16x32xf32>
    %17 = arith.truncf %16 : vector<16x32xf32> to vector<16x32xbf16>
    %c0_5 = arith.constant 0 : index
    %c0_6 = arith.constant 0 : index
    %18 = vector.load %arg3[%c0_5, %c0_6] : memref<16x32xf32, #tpu.memory_space<vmem>>, vector<16x32xf32>
    %c0_7 = arith.constant 0 : index
    %c0_8 = arith.constant 0 : index
    %c0_9 = arith.constant 0 : index
    %19 = vector.load %arg1[%c0_7, %c0_8, %c0_9] : memref<4x32x32xbf16, #tpu.memory_space<vmem>>, vector<1x32x32xbf16>
    %20 = vector.shape_cast %19 : vector<1x32x32xbf16> to vector<32x32xbf16>
    %cst_10 = arith.constant dense<0.000000e+00> : vector<16x32xf32>
    %21 = tpu.matmul %17, %20, %cst_10 {dimension_numbers = #tpu.dot_dimension_numbers<[1], [0], [0], [1], [0, 0, 1, 1], [], []>} : vector<16x32xbf16>, vector<32x32xbf16>, vector<16x32xf32> -> vector<16x32xf32>
    %c0_11 = arith.constant 0 : index
    %c0_12 = arith.constant 0 : index
    %c0_13 = arith.constant 0 : index
    %22 = vector.load %arg2[%c0_11, %c0_12, %c0_13] : memref<4x16x16xbf16, #tpu.memory_space<vmem>>, vector<1x16x16xbf16>
    %23 = vector.shape_cast %22 : vector<1x16x16xbf16> to vector<16x16xbf16>
    %24 = arith.truncf %21 : vector<16x32xf32> to vector<16x32xbf16>
    %cst_14 = arith.constant dense<0.000000e+00> : vector<16x32xf32>
    %25 = tpu.matmul %23, %24, %cst_14 {dimension_numbers = #tpu.dot_dimension_numbers<[1], [0], [0], [1], [0, 0, 1, 1], [], []>} : vector<16x16xbf16>, vector<16x32xbf16>, vector<16x32xf32> -> vector<16x32xf32>
    %26 = arith.addf %18, %25 : vector<16x32xf32>
    %c1 = arith.constant 1 : index
    %c0_15 = arith.constant 0 : index
    %c0_16 = arith.constant 0 : index
    %27 = vector.load %arg1[%c1, %c0_15, %c0_16] : memref<4x32x32xbf16, #tpu.memory_space<vmem>>, vector<1x32x32xbf16>
    %28 = vector.shape_cast %27 : vector<1x32x32xbf16> to vector<32x32xbf16>
    %cst_17 = arith.constant dense<0.000000e+00> : vector<16x32xf32>
    %29 = tpu.matmul %17, %28, %cst_17 {dimension_numbers = #tpu.dot_dimension_numbers<[1], [0], [0], [1], [0, 0, 1, 1], [], []>} : vector<16x32xbf16>, vector<32x32xbf16>, vector<16x32xf32> -> vector<16x32xf32>
    %c1_18 = arith.constant 1 : index
    %c0_19 = arith.constant 0 : index
    %c0_20 = arith.constant 0 : index
    %30 = vector.load %arg2[%c1_18, %c0_19, %c0_20] : memref<4x16x16xbf16, #tpu.memory_space<vmem>>, vector<1x16x16xbf16>
    %31 = vector.shape_cast %30 : vector<1x16x16xbf16> to vector<16x16xbf16>
    %32 = arith.truncf %29 : vector<16x32xf32> to vector<16x32xbf16>
    %cst_21 = arith.constant dense<0.000000e+00> : vector<16x32xf32>
    %33 = tpu.matmul %31, %32, %cst_21 {dimension_numbers = #tpu.dot_dimension_numbers<[1], [0], [0], [1], [0, 0, 1, 1], [], []>} : vector<16x16xbf16>, vector<16x32xbf16>, vector<16x32xf32> -> vector<16x32xf32>
    %34 = arith.addf %26, %33 : vector<16x32xf32>
    %c2 = arith.constant 2 : index
    %c0_22 = arith.constant 0 : index
    %c0_23 = arith.constant 0 : index
    %35 = vector.load %arg1[%c2, %c0_22, %c0_23] : memref<4x32x32xbf16, #tpu.memory_space<vmem>>, vector<1x32x32xbf16>
    %36 = vector.shape_cast %35 : vector<1x32x32xbf16> to vector<32x32xbf16>
    %cst_24 = arith.constant dense<0.000000e+00> : vector<16x32xf32>
    %37 = tpu.matmul %17, %36, %cst_24 {dimension_numbers = #tpu.dot_dimension_numbers<[1], [0], [0], [1], [0, 0, 1, 1], [], []>} : vector<16x32xbf16>, vector<32x32xbf16>, vector<16x32xf32> -> vector<16x32xf32>
    %c2_25 = arith.constant 2 : index
    %c0_26 = arith.constant 0 : index
    %c0_27 = arith.constant 0 : index
    %38 = vector.load %arg2[%c2_25, %c0_26, %c0_27] : memref<4x16x16xbf16, #tpu.memory_space<vmem>>, vector<1x16x16xbf16>
    %39 = vector.shape_cast %38 : vector<1x16x16xbf16> to vector<16x16xbf16>
    %40 = arith.truncf %37 : vector<16x32xf32> to vector<16x32xbf16>
    %cst_28 = arith.constant dense<0.000000e+00> : vector<16x32xf32>
    %41 = tpu.matmul %39, %40, %cst_28 {dimension_numbers = #tpu.dot_dimension_numbers<[1], [0], [0], [1], [0, 0, 1, 1], [], []>} : vector<16x16xbf16>, vector<16x32xbf16>, vector<16x32xf32> -> vector<16x32xf32>
    %42 = arith.addf %34, %41 : vector<16x32xf32>
    %c3 = arith.constant 3 : index
    %c0_29 = arith.constant 0 : index
    %c0_30 = arith.constant 0 : index
    %43 = vector.load %arg1[%c3, %c0_29, %c0_30] : memref<4x32x32xbf16, #tpu.memory_space<vmem>>, vector<1x32x32xbf16>
    %44 = vector.shape_cast %43 : vector<1x32x32xbf16> to vector<32x32xbf16>
    %cst_31 = arith.constant dense<0.000000e+00> : vector<16x32xf32>
    %45 = tpu.matmul %17, %44, %cst_31 {dimension_numbers = #tpu.dot_dimension_numbers<[1], [0], [0], [1], [0, 0, 1, 1], [], []>} : vector<16x32xbf16>, vector<32x32xbf16>, vector<16x32xf32> -> vector<16x32xf32>
    %c3_32 = arith.constant 3 : index
    %c0_33 = arith.constant 0 : index
    %c0_34 = arith.constant 0 : index
    %46 = vector.load %arg2[%c3_32, %c0_33, %c0_34] : memref<4x16x16xbf16, #tpu.memory_space<vmem>>, vector<1x16x16xbf16>
    %47 = vector.shape_cast %46 : vector<1x16x16xbf16> to vector<16x16xbf16>
    %48 = arith.truncf %45 : vector<16x32xf32> to vector<16x32xbf16>
    %cst_35 = arith.constant dense<0.000000e+00> : vector<16x32xf32>
    %49 = tpu.matmul %47, %48, %cst_35 {dimension_numbers = #tpu.dot_dimension_numbers<[1], [0], [0], [1], [0, 0, 1, 1], [], []>} : vector<16x16xbf16>, vector<16x32xbf16>, vector<16x32xf32> -> vector<16x32xf32>
    %50 = arith.addf %42, %49 : vector<16x32xf32>
    %51 = arith.addf %0, %50 : vector<16x32xf32>
    %cst_36 = arith.constant dense<0.000000e+00> : vector<16xf32>
    %52 = vector.multi_reduction <add>, %51, %cst_36 [1] : vector<16x32xf32> to vector<16xf32>
    %53 = vector.shape_cast %52 : vector<16xf32> to vector<16x1xf32>
    %cst_37 = arith.constant 3.200000e+01 : f32
    %54 = vector.broadcast %cst_37 : f32 to vector<16x1xf32>
    %55 = arith.divf %53, %54 : vector<16x1xf32>
    %56 = vector.broadcast %55 : vector<16x1xf32> to vector<16x32xf32>
    %57 = arith.subf %51, %56 : vector<16x32xf32>
    %58 = arith.mulf %57, %57 : vector<16x32xf32>
    %cst_38 = arith.constant dense<0.000000e+00> : vector<16xf32>
    %59 = vector.multi_reduction <add>, %58, %cst_38 [1] : vector<16x32xf32> to vector<16xf32>
    %60 = vector.shape_cast %59 : vector<16xf32> to vector<16x1xf32>
    %cst_39 = arith.constant 3.200000e+01 : f32
    %61 = vector.broadcast %cst_39 : f32 to vector<16x1xf32>
    %62 = arith.divf %60, %61 : vector<16x1xf32>
    %cst_40 = arith.constant 9.99999974E-6 : f32
    %63 = vector.broadcast %cst_40 : f32 to vector<16x1xf32>
    %64 = arith.addf %62, %63 : vector<16x1xf32>
    %65 = math.rsqrt %64 : vector<16x1xf32>
    %66 = vector.broadcast %65 : vector<16x1xf32> to vector<16x32xf32>
    %67 = arith.mulf %57, %66 : vector<16x32xf32>
    %68 = arith.truncf %67 : vector<16x32xf32> to vector<16x32xbf16>
    %c0_41 = arith.constant 0 : index
    %c0_42 = arith.constant 0 : index
    %69 = vector.load %arg4[%c0_41, %c0_42] : memref<32x128xbf16, #tpu.memory_space<vmem>>, vector<32x128xbf16>
    %cst_43 = arith.constant dense<0.000000e+00> : vector<16x128xf32>
    %70 = tpu.matmul %68, %69, %cst_43 {dimension_numbers = #tpu.dot_dimension_numbers<[1], [0], [0], [1], [0, 0, 1, 1], [], []>} : vector<16x32xbf16>, vector<32x128xbf16>, vector<16x128xf32> -> vector<16x128xf32>
    %c0_44 = arith.constant 0 : index
    %c0_45 = arith.constant 0 : index
    %71 = vector.load %arg5[%c0_44, %c0_45] : memref<1x128xf32, #tpu.memory_space<vmem>>, vector<1x128xf32>
    %72 = vector.broadcast %71 : vector<1x128xf32> to vector<16x128xf32>
    %73 = arith.addf %70, %72 : vector<16x128xf32>
    %cst_46 = arith.constant 5.000000e-01 : f32
    %74 = vector.broadcast %cst_46 : f32 to vector<16x128xf32>
    %75 = arith.mulf %74, %73 : vector<16x128xf32>
    %cst_47 = arith.constant 0.707106769 : f32
    %76 = vector.broadcast %cst_47 : f32 to vector<16x128xf32>
    %77 = arith.mulf %73, %76 : vector<16x128xf32>
    %cst_48 = arith.constant 0.000000e+00 : f32
    %78 = vector.broadcast %cst_48 : f32 to vector<16x128xf32>
    %79 = arith.cmpf oge, %77, %78 : vector<16x128xf32>
    %cst_49 = arith.constant 1.000000e+00 : f32
    %cst_50 = arith.constant -1.000000e+00 : f32
    %80 = vector.broadcast %cst_49 : f32 to vector<16x128xf32>
    %81 = vector.broadcast %cst_50 : f32 to vector<16x128xf32>
    %82 = arith.select %79, %80, %81 : vector<16x128xi1>, vector<16x128xf32>
    %83 = math.absf %77 : vector<16x128xf32>
    %cst_51 = arith.constant 0.327591091 : f32
    %84 = vector.broadcast %cst_51 : f32 to vector<16x128xf32>
    %85 = arith.mulf %84, %83 : vector<16x128xf32>
    %cst_52 = arith.constant 1.000000e+00 : f32
    %86 = vector.broadcast %cst_52 : f32 to vector<16x128xf32>
    %87 = arith.addf %86, %85 : vector<16x128xf32>
    %cst_53 = arith.constant 1.000000e+00 : f32
    %88 = vector.broadcast %cst_53 : f32 to vector<16x128xf32>
    %89 = arith.divf %88, %87 : vector<16x128xf32>
    %cst_54 = arith.constant 1.06140542 : f32
    %90 = vector.broadcast %cst_54 : f32 to vector<16x128xf32>
    %91 = arith.mulf %90, %89 : vector<16x128xf32>
    %cst_55 = arith.constant -1.45315206 : f32
    %92 = vector.broadcast %cst_55 : f32 to vector<16x128xf32>
    %93 = arith.addf %91, %92 : vector<16x128xf32>
    %94 = arith.mulf %93, %89 : vector<16x128xf32>
    %cst_56 = arith.constant 1.42141378 : f32
    %95 = vector.broadcast %cst_56 : f32 to vector<16x128xf32>
    %96 = arith.addf %94, %95 : vector<16x128xf32>
    %97 = arith.mulf %96, %89 : vector<16x128xf32>
    %cst_57 = arith.constant -0.284496725 : f32
    %98 = vector.broadcast %cst_57 : f32 to vector<16x128xf32>
    %99 = arith.addf %97, %98 : vector<16x128xf32>
    %100 = arith.mulf %99, %89 : vector<16x128xf32>
    %cst_58 = arith.constant 0.254829586 : f32
    %101 = vector.broadcast %cst_58 : f32 to vector<16x128xf32>
    %102 = arith.addf %100, %101 : vector<16x128xf32>
    %103 = arith.mulf %102, %89 : vector<16x128xf32>
    %cst_59 = arith.constant 0.000000e+00 : f32
    %104 = vector.broadcast %cst_59 : f32 to vector<16x128xf32>
    %105 = arith.subf %104, %83 : vector<16x128xf32>
    %106 = arith.mulf %105, %83 : vector<16x128xf32>
    %107 = math.exp %106 : vector<16x128xf32>
    %108 = arith.mulf %103, %107 : vector<16x128xf32>
    %cst_60 = arith.constant 1.000000e+00 : f32
    %109 = vector.broadcast %cst_60 : f32 to vector<16x128xf32>
    %110 = arith.subf %109, %108 : vector<16x128xf32>
    %111 = arith.mulf %82, %110 : vector<16x128xf32>
    %cst_61 = arith.constant 1.000000e+00 : f32
    %112 = vector.broadcast %cst_61 : f32 to vector<16x128xf32>
    %113 = arith.addf %112, %111 : vector<16x128xf32>
    %114 = arith.mulf %75, %113 : vector<16x128xf32>
    %115 = arith.truncf %114 : vector<16x128xf32> to vector<16x128xbf16>
    %c0_62 = arith.constant 0 : index
    %c0_63 = arith.constant 0 : index
    %116 = vector.load %arg6[%c0_62, %c0_63] : memref<128x32xbf16, #tpu.memory_space<vmem>>, vector<128x32xbf16>
    %cst_64 = arith.constant dense<0.000000e+00> : vector<16x32xf32>
    %117 = tpu.matmul %115, %116, %cst_64 {dimension_numbers = #tpu.dot_dimension_numbers<[1], [0], [0], [1], [0, 0, 1, 1], [], []>} : vector<16x128xbf16>, vector<128x32xbf16>, vector<16x32xf32> -> vector<16x32xf32>
    %118 = arith.addf %51, %117 : vector<16x32xf32>
    %c0_65 = arith.constant 0 : index
    %c0_66 = arith.constant 0 : index
    %119 = vector.load %arg7[%c0_65, %c0_66] : memref<16x32xf32, #tpu.memory_space<vmem>>, vector<16x32xf32>
    tpu.vector_store %arg7[%c0_65, %c0_66], %118 {strides = array<i32>} : memref<16x32xf32, #tpu.memory_space<vmem>>, vector<16x32xf32>,
    return
  }
}

</mosaic_0001>

<bundles_post_ra>
// kernel: tpu_custom_call.1
= control target key start
LH: loop header
LB: loop body
LE: loop exit
PB: predicated region body
PF: predicated region fallthrough
CT: control target
= control target key end

     0   :  { %12 = vsyncpa [#allocation3], 0  ;;  %s1089_s0 = inlined_call_operand.vmem [shape: f32[16,32], index: 0, kind: input, shape index: {}]   ;;  %s1090_s1 = inlined_call_operand.vmem [shape: bf16[4,32,32], index: 1, kind: input, shape index: {}]   ;;  %s1091_s2 = inlined_call_operand.hbm [shape: bf16[4,16,16], index: 2, kind: input, shape index: {}]   ;;  %s1092_s3 = inlined_call_operand.hbm [shape: f32[16,32], index: 3, kind: input, shape index: {}]   ;;  %s1093_s4 = inlined_call_operand.hbm [shape: bf16[32,128], index: 4, kind: input, shape index: {}]   ;;  %s1094_s5 = inlined_call_operand.vmem [shape: f32[1,128], index: 5, kind: input, shape index: {}]   ;;  %s1095_s6 = inlined_call_operand.vmem [shape: bf16[128,32], index: 6, kind: input, shape index: {}]   ;;  %s1096_s7 = inlined_call_operand.hbm [shape: f32[16,32], index: 7, kind: output, shape index: {}]  }
   0x1   :  { %13 = vsyncpa [#allocation6], 0  ;;  %s36_s26 = sshll.u32 %s1092_s3, 4  ;;  %s37_s26 = int_to_ptr.hbm [resolvable:$true] %s36_s26 }
   0x2   :  { %14 = vsyncpa [#allocation4], 0  ;;  %s899_s27 = smov [#allocation5]   ;;  %s23_s8 = sshll.u32 %s1091_s2, 4  ;;  %s24_s8 = int_to_ptr.hbm [resolvable:$true] %s23_s8 }
   0x3   :  { %s38_s28 = sshll.u32 %s899_s27, 4  ;;  %s900_s9 = smov 128   ;;  %s39_s28 = int_to_ptr.vmem [resolvable:$true] %s38_s28 }
   0x4   :  { %s901_s10 = smov 8   ;;  %s902_s11 = smov [#allocation2]  }
   0x5   :  { %44 = dma.hbm_to_vmem [thread:$0]  %s37_s26, 256, %s39_s28, [#allocation6], %s900_s9, %s900_s9, %s901_s10  }
   0x6   :  { %s25_s12 = sshll.u32 %s902_s11, 4  ;;  %s903_s3 = smov 64   ;;  %s26_s12 = int_to_ptr.vmem [resolvable:$true] %s25_s12 }
   0x7   :  { %s904_s13 = smov 4   ;;  %s49_s16 = sshll.u32 %s1093_s4, 4  ;;  %s50_s16 = int_to_ptr.hbm [resolvable:$true] %s49_s16 }
   0x8   :  { %31 = dma.hbm_to_vmem [thread:$0]  %s24_s8, 512, %s26_s12, [#allocation3], %s903_s3, %s903_s3, %s904_s13  }
   0x9   :  { %s905_s17 = smov [#allocation7]  }
   0xa   :  { %s51_s2 = sshll.u32 %s905_s17, 4  ;;  %s52_s2 = int_to_ptr.vmem [resolvable:$true] %s51_s2 }
   0xb   :  { %57 = dma.hbm_to_vmem [thread:$0]  %s50_s16, 256, %s52_s2, [#allocation6], %s903_s3, %s903_s3, %s904_s13  }
   0xc   :  { %893 = dma.done.wait [#allocation3], 512  }
   0xd   :  { %894 = vsyncadd [#allocation3], 4294966784 }
   0xe   :  { %895 = dma.done.wait [#allocation6], 512  }
   0xf   :  { %896 = vsyncadd [#allocation6], 4294966784  ;;  %vm77_vm0 = vcmask 261120   ;;  %v964_v0 = vld [vmem:[%s1089_s0] sm:$0xff]  ;;  %v971_v2 = vld [vmem:[%s1089_s0 + $0x8] sm:$0xff]  ;;  %v906_v4 = vmov 32.0  }
  0x10   :  { %v78_v1 = vsel %vm77_vm0, %v964_v0, 0.0  ;;  %v81_v3 = vsel %vm77_vm0, %v971_v2, 0.0  ;;  %779 = vrcp.f32 %v906_v4  ;;  %v747_v21 = vld [vmem:[%s1090_s1 + $0x8] sm:$0xff]  ;;  %v750_v22 = vld [vmem:[%s1090_s1 + $0x18] sm:$0xff]  ;;  %v746_v23 = vld [vmem:[%s1090_s1] sm:$0xff]  ;;  %vm173_vm8 = vcmask 130048  }
  0x11   :  { %79 = vadd.xlane.f32.xlu0 %v78_v1  ;;  %157 = vmatpush.bf16.msra.mxu0 %v747_v21  ;;  %v749_v24 = vld [vmem:[%s1090_s1 + $0x10] sm:$0xff]  ;;  %v753_v51 = vld [vmem:[%s1090_s1 + $0x28] sm:$0xff]  ;;  %v748_v53 = vld [vmem:[#allocation2] sm:$0xff]  ;;  %s623_s30 = sshll.u32 %s1096_s7, 4  ;;  %s624_s30 = int_to_ptr.hbm [resolvable:$true] %s623_s30 }
  0x12   :  { %216 = vmatpush.bf16.msra.mxu2 %v750_v22  ;;  %v752_v54 = vld [vmem:[%s1090_s1 + $0x20] sm:$0xff]  ;;  %v756_v56 = vld [vmem:[%s1090_s1 + $0x38] sm:$0xff]  ;;  %v751_v58 = vld [vmem:[#allocation2 + $0x8] sm:$0xff] }
  0x13   :  { %v755_v59 = vld [vmem:[%s1090_s1 + $0x30] sm:$0xff]  ;;  %v130_v60 = vld [vmem:[#allocation5] sm:$0xff]  ;;  %v131_v4 = vld [vmem:[#allocation5 + $0x8] sm:$0xff] }
  0x15   :  { %158 = vmatpush.bf16.msra.mxu0 %v746_v23 }
  0x16   :  { %v780_v5 = vpop.eup %779  ;;  %217 = vmatpush.bf16.msra.mxu2 %v749_v24 }
  0x17   :  { %v85_v6 = vmul.f32 32.0, %v780_v5  ;;  %vm89_vm1 = vweird.f32 %v780_v5 }
  0x19   :  { %82 = vadd.xlane.f32.xlu0 %v81_v3  ;;  %v86_v7 = vsub.f32 1.0, %v85_v6 }
  0x1b   :  { %v87_v8 = vmul.f32 %v780_v5, %v86_v7 }
  0x1d   :  { %v88_v9 = vadd.f32 %v780_v5, %v87_v8 }
  0x1f   :  { %v975_v10 = vsel %vm89_vm1, %v780_v5, %v88_v9 }
  0x84   :  { %v80_v11 = vpop.xlane.xlu0 %79 }
  0x85   :  { %v91_v12 = vmul.f32 %v975_v10, %v80_v11 }
  0x87   :  { %v93_v13 = vsub.f32 %v964_v0, %v91_v12 }
  0x89   :  { %v95_v14 = vmul.f32 %v93_v13, %v93_v13 }
  0x8b   :  { %v97_v15 = vsel %vm77_vm0, %v95_v14, 0.0 }
  0x8c   :  { %98 = vadd.xlane.f32.xlu1 %v97_v15  ;;  %v83_v16 = vpop.xlane.xlu0 %82 }
  0x8d   :  { %v92_v17 = vmul.f32 %v975_v10, %v83_v16  ;;  %v757_v16 = vld [vmem:[#allocation2 + $0x18] sm:$0xff] }
  0x8f   :  { %v94_v18 = vsub.f32 %v971_v2, %v92_v17 }
  0x91   :  { %v96_v19 = vmul.f32 %v94_v18, %v94_v18 }
  0x93   :  { %v100_v20 = vsel %vm77_vm0, %v96_v19, 0.0 }
  0x94   :  { %101 = vadd.xlane.f32.xlu1 %v100_v20 }
  0xff   :  { %v99_v25 = vpop.xlane.xlu1 %98 }
 0x100   :  { %v103_v26 = vmul.f32 %v99_v25, %v975_v10 }
 0x102   :  { %v105_v27 = vadd.f32 1e-05, %v103_v26 }
 0x104   :  { %781 = vrsqrt.f32 %v105_v27  ;;  %vm113_vm3 = vweird.f32 %v105_v27 }
 0x107   :  { %v102_v28 = vpop.xlane.xlu1 %101 }
 0x108   :  { %v104_v29 = vmul.f32 %v102_v28, %v975_v10 }
 0x10a   :  { %v782_v30 = vpop.eup %781  ;;  %v106_v31 = vadd.f32 1e-05, %v104_v29 }
 0x10b   :  { %v108_v32 = vmul.f32 %v782_v30, %v105_v27  ;;  %vm114_vm2 = vweird.f32 %v782_v30 }
 0x10c   :  { %783 = vrsqrt.f32 %v106_v31  ;;  %vm115_vm5 = vmor %vm113_vm3, %vm114_vm2  ;;  %vm123_vm6 = vweird.f32 %v106_v31 }
 0x10d   :  { %v109_v33 = vmul.f32 %v782_v30, %v108_v32 }
 0x10f   :  { %v110_v34 = vmul.f32 0.5, %v109_v33 }
 0x111   :  { %v111_v36 = vsub.f32 1.5, %v110_v34 }
 0x112   :  { %v784_v35 = vpop.eup %783 }
 0x113   :  { %v118_v37 = vmul.f32 %v784_v35, %v106_v31  ;;  %v112_v39 = vmul.f32 %v782_v30, %v111_v36  ;;  %vm124_vm4 = vweird.f32 %v784_v35 }
 0x114   :  { %vm125_vm7 = vmor %vm123_vm6, %vm124_vm4 }
 0x115   :  { %v119_v38 = vmul.f32 %v784_v35, %v118_v37  ;;  %v116_v42 = vsel %vm115_vm5, %v782_v30, %v112_v39  ;;  %v759_v37 = vld [vmem:[#allocation7 + $0x8] sm:$0xff] }
 0x116   :  { %v127_v45 = vmul.f32 %v116_v42, %v93_v13  ;;  %v754_v13 = vld [vmem:[#allocation2 + $0x10] sm:$0xff] }
 0x117   :  { %v120_v40 = vmul.f32 0.5, %v119_v38  ;;  %v758_v38 = vld [vmem:[#allocation7] sm:$0xff] }
 0x119   :  { %v121_v41 = vsub.f32 1.5, %v120_v40 }
 0x11b   :  { %v122_v43 = vmul.f32 %v784_v35, %v121_v41 }
 0x11d   :  { %v126_v44 = vsel %vm125_vm7, %v784_v35, %v122_v43 }
 0x11e   :  { %v128_v46 = vmul.f32 %v126_v44, %v94_v18 }
 0x120   :  { %v129_v47 = vpack.c.bf16 %v128_v46, %v127_v45 }
 0x122   :  { %645 = vmatmul.msk.bf16.vlgmr.msra.gmra.mxu0 %vm77_vm0, %v129_v47  ;;  %663 = vmatmul.msk.bf16.vlgmr.msra.gmra.mxu2 %vm77_vm0, %v129_v47 }
 0x19f   :  { %v160_v48 = vpop.f32.mrf.mxu0 }
 0x1a5   :  { %v219_v49 = vpop.f32.mrf.mxu2 }
 0x1a7   :  { %v162_v50 = vpop.f32.mrf.mxu0 }
 0x1a8   :  { %v167_v52 = vpack.c.bf16 %v162_v50, %v160_v48 }
 0x1aa   :  { %184 = vmatpush.bf16.msra.mxu1 %v167_v52 }
 0x1ad   :  { %650 = vmatmul.msk.bf16.vlgmr.msra.gmra.mxu1 %vm173_vm8, %v748_v53  ;;  %v221_v55 = vpop.f32.mrf.mxu2 }
 0x1ae   :  { %275 = vmatpush.bf16.msrb.mxu1 %v753_v51  ;;  %v227_v57 = vpack.c.bf16 %v221_v55, %v219_v49 }
 0x1b0   :  { %243 = vmatpush.bf16.msrb.mxu0 %v227_v57 }
 0x1b2   :  { %276 = vmatpush.bf16.msrb.mxu1 %v752_v54 }
 0x1b3   :  { %668 = vmatmul.msk.bf16.vlgmr.msrb.gmra.mxu0 %vm173_vm8, %v751_v58 }
 0x1b4   :  { %334 = vmatpush.bf16.msra.mxu0 %v756_v56 }
 0x1b6   :  { %446 = vmatpush.bf16.msra.mxu1 %v759_v37 }
 0x1b8   :  { %335 = vmatpush.bf16.msra.mxu0 %v755_v59 }
 0x1ba   :  { %447 = vmatpush.bf16.msra.mxu1 %v758_v38 }
 0x1bd   :  { %681 = vmatmul.msk.bf16.vlgmr.msrb.gmra.mxu1 %vm77_vm0, %v129_v47 }
 0x1c3   :  { %699 = vmatmul.msk.bf16.vlgmr.msra.gmra.mxu0 %vm77_vm0, %v129_v47 }
 0x22a   :  { %v186_v61 = vpop.f32.mrf.mxu1 }
 0x22b   :  { %v191_v62 = vadd.f32 %v186_v61, %v130_v60  ;;  %v778_v61 = vld [vmem:[%s1094_s5] ss:$0 sm:$0xff] }
 0x230   :  { %v245_v63 = vpop.f32.mrf.mxu0 }
 0x231   :  { %v250_v1 = vadd.f32 %v245_v63, %v191_v62 }
 0x232   :  { %v188_v3 = vpop.f32.mrf.mxu1 }
 0x233   :  { %v192_v5 = vadd.f32 %v188_v3, %v131_v4  ;;  %v767_v3 = vld [vmem:[%s1095_s6 + $0x38] sm:$0xff] }
 0x238   :  { %v247_v6 = vpop.f32.mrf.mxu0 }
 0x239   :  { %v251_v7 = vadd.f32 %v247_v6, %v192_v5  ;;  %v766_v6 = vld [vmem:[%s1095_s6 + $0x30] sm:$0xff] }
 0x23a   :  { %v278_v8 = vpop.f32.mrf.mxu1 }
 0x240   :  { %v337_v9 = vpop.f32.mrf.mxu0 }
 0x242   :  { %v280_v11 = vpop.f32.mrf.mxu1 }
 0x243   :  { %v286_v12 = vpack.c.bf16 %v280_v11, %v278_v8  ;;  %v765_v11 = vld [vmem:[%s1095_s6 + $0x28] sm:$0xff] }
 0x245   :  { %302 = vmatpush.bf16.msra.mxu3 %v286_v12 }
 0x248   :  { %686 = vmatmul.msk.bf16.vlgmr.msra.gmra.mxu3 %vm173_vm8, %v754_v13  ;;  %v339_v14 = vpop.f32.mrf.mxu0 }
 0x249   :  { %v345_v15 = vpack.c.bf16 %v339_v14, %v337_v9  ;;  %599 = vmatpush.bf16.msrb.mxu3 %v767_v3  ;;  %v764_v14 = vld [vmem:[%s1095_s6 + $0x20] sm:$0xff] }
 0x24b   :  { %361 = vmatpush.bf16.msrb.mxu2 %v345_v15 }
 0x24d   :  { %600 = vmatpush.bf16.msrb.mxu3 %v766_v6 }
 0x24e   :  { %704 = vmatmul.msk.bf16.vlgmr.msrb.gmra.mxu2 %vm173_vm8, %v757_v16 }
 0x251   :  { %601 = vmatpush.bf16.msrb.mxu3 %v765_v11 }
 0x255   :  { %602 = vmatpush.bf16.msrb.mxu3 %v764_v14 }
 0x2cb   :  { %v304_v17 = vpop.f32.mrf.mxu3 }
 0x2cc   :  { %v309_v18 = vadd.f32 %v304_v17, %v250_v1 }
 0x2d1   :  { %v363_v19 = vpop.f32.mrf.mxu2 }
 0x2d2   :  { %v368_v20 = vadd.f32 %v363_v19, %v309_v18  ;;  %v763_v19 = vld [vmem:[%s1095_s6 + $0x18] sm:$0xff] }
 0x2d3   :  { %v306_v22 = vpop.f32.mrf.mxu3  ;;  %603 = vmatpush.bf16.msrb.mxu3 %v763_v19 }
 0x2d4   :  { %v1018_v21 = vadd.f32 %v368_v20, %v964_v0  ;;  %v310_v24 = vadd.f32 %v306_v22, %v251_v7 }
 0x2d6   :  { %v372_v23 = vsel %vm77_vm0, %v1018_v21, 0.0 }
 0x2d7   :  { %373 = vadd.xlane.f32.xlu2 %v372_v23 }
 0x2d9   :  { %v365_v25 = vpop.f32.mrf.mxu2 }
 0x2da   :  { %v369_v26 = vadd.f32 %v365_v25, %v310_v24  ;;  %v762_v25 = vld [vmem:[%s1095_s6 + $0x10] sm:$0xff] }
 0x2db   :  { %604 = vmatpush.bf16.msrb.mxu3 %v762_v25 }
 0x2dc   :  { %v1023_v27 = vadd.f32 %v369_v26, %v971_v2 }
 0x2de   :  { %v375_v28 = vsel %vm77_vm0, %v1023_v27, 0.0 }
 0x2df   :  { %376 = vadd.xlane.f32.xlu2 %v375_v28 }
 0x34a   :  { %v374_v29 = vpop.xlane.xlu2 %373 }
 0x34b   :  { %v378_v30 = vmul.f32 %v374_v29, %v975_v10 }
 0x34d   :  { %v380_v0 = vsub.f32 %v1018_v21, %v378_v30 }
 0x34f   :  { %v382_v31 = vmul.f32 %v380_v0, %v380_v0 }
 0x351   :  { %v384_v32 = vsel %vm77_vm0, %v382_v31, 0.0 }
 0x352   :  { %385 = vadd.xlane.f32.xlu0 %v384_v32  ;;  %v377_v33 = vpop.xlane.xlu2 %376  ;;  %v761_v32 = vld [vmem:[%s1095_s6 + $0x8] sm:$0xff] }
 0x353   :  { %v379_v34 = vmul.f32 %v377_v33, %v975_v10  ;;  %605 = vmatpush.bf16.msrb.mxu3 %v761_v32 }
 0x355   :  { %v381_v35 = vsub.f32 %v1023_v27, %v379_v34 }
 0x357   :  { %v383_v2 = vmul.f32 %v381_v35, %v381_v35 }
 0x359   :  { %v387_v36 = vsel %vm77_vm0, %v383_v2, 0.0 }
 0x35a   :  { %388 = vadd.xlane.f32.xlu1 %v387_v36 }
 0x3c5   :  { %v386_v39 = vpop.xlane.xlu0 %385 }
 0x3c6   :  { %v390_v40 = vmul.f32 %v386_v39, %v975_v10  ;;  %v760_v39 = vld [vmem:[%s1095_s6] sm:$0xff]  ;;  %s908_s6 = smov [#allocation8]  }
 0x3c7   :  { %606 = vmatpush.bf16.msrb.mxu3 %v760_v39  ;;  %s621_s27 = sshll.u32 %s908_s6, 4  ;;  %s622_s27 = int_to_ptr.vmem [resolvable:$true] %s621_s27 }
 0x3c8   :  { %v392_v41 = vadd.f32 1e-05, %v390_v40 }
 0x3ca   :  { %785 = vrsqrt.f32 %v392_v41  ;;  %vm400_vm10 = vweird.f32 %v392_v41 }
 0x3cd   :  { %v389_v42 = vpop.xlane.xlu1 %388 }
 0x3ce   :  { %v391_v43 = vmul.f32 %v389_v42, %v975_v10 }
 0x3d0   :  { %v786_v44 = vpop.eup %785  ;;  %v393_v45 = vadd.f32 1e-05, %v391_v43 }
 0x3d1   :  { %v395_v46 = vmul.f32 %v786_v44, %v392_v41  ;;  %vm401_vm9 = vweird.f32 %v786_v44 }
 0x3d2   :  { %787 = vrsqrt.f32 %v393_v45  ;;  %vm402_vm12 = vmor %vm400_vm10, %vm401_vm9  ;;  %vm410_vm13 = vweird.f32 %v393_v45 }
 0x3d3   :  { %v396_v47 = vmul.f32 %v786_v44, %v395_v46 }
 0x3d5   :  { %v397_v48 = vmul.f32 0.5, %v396_v47 }
 0x3d7   :  { %v398_v50 = vsub.f32 1.5, %v397_v48 }
 0x3d8   :  { %v788_v49 = vpop.eup %787 }
 0x3d9   :  { %v405_v51 = vmul.f32 %v788_v49, %v393_v45  ;;  %v399_v53 = vmul.f32 %v786_v44, %v398_v50  ;;  %vm411_vm11 = vweird.f32 %v788_v49 }
 0x3da   :  { %vm412_vm14 = vmor %vm410_vm13, %vm411_vm11 }
 0x3db   :  { %v406_v52 = vmul.f32 %v788_v49, %v405_v51  ;;  %v403_v56 = vsel %vm402_vm12, %v786_v44, %v399_v53 }
 0x3dc   :  { %v414_v58 = vmul.f32 %v403_v56, %v380_v0 }
 0x3dd   :  { %v407_v54 = vmul.f32 0.5, %v406_v52 }
 0x3df   :  { %v408_v55 = vsub.f32 1.5, %v407_v54 }
 0x3e1   :  { %v409_v57 = vmul.f32 %v788_v49, %v408_v55 }
 0x3e3   :  { %v413_v10 = vsel %vm412_vm14, %v788_v49, %v409_v57 }
 0x3e4   :  { %v415_v59 = vmul.f32 %v413_v10, %v381_v35 }
 0x3e6   :  { %v416_v60 = vpack.c.bf16 %v415_v59, %v414_v58 }
 0x3e8   :  { %713 = vmatmul.msk.bf16.vlgmr.msra.gmra.mxu1 %vm77_vm0, %v416_v60 }
 0x465   :  { %v449_v62 = vpop.f32.mrf.mxu1 }
 0x466   :  { %v1039_v63 = vadd.f32 %v778_v61, %v449_v62 }
 0x468   :  { %v1042_v1 = vmul.f32 0.70710677, %v1039_v63  ;;  %v454_v19 = vmul.f32 0.5, %v1039_v63 }
 0x46a   :  { %v462_v4 = vand.u32 2147483647, %v1042_v1  ;;  %vm458_vm8 = vcmp.ge.f32.partialorder %v1042_v1, 0.0 }
 0x46c   :  { %v464_v5 = vmul.f32 0.3275911, %v462_v4  ;;  %v516_v34 = vsub.f32 0.0, %v462_v4 }
 0x46d   :  { %v451_v7 = vpop.f32.mrf.mxu1 }
 0x46e   :  { %v466_v8 = vadd.f32 1.0, %v464_v5  ;;  %v1051_v9 = vadd.f32 %v778_v61, %v451_v7  ;;  %v518_v41 = vmul.f32 %v516_v34, %v462_v4 }
 0x470   :  { %789 = vrcp.f32 %v466_v8  ;;  %v1057_v12 = vmul.f32 0.70710677, %v1051_v9  ;;  %v479_v22 = vand.u32 2147483648, %v466_v8  ;;  %v477_v24 = vand.u32 2147483647, %v466_v8 }
 0x471   :  { %vm473_vm1 = vweird.f32 %v466_v8  ;;  %v520_v47 = vmul.f32 1.442695, %v518_v41 }
 0x472   :  { %v463_v13 = vand.u32 2147483647, %v1057_v12  ;;  %v480_v28 = vor.u32 1.1754944e-38, %v479_v22  ;;  %vm478_vm3 = vcmp.eq.f32.partialorder %v477_v24, 8.507059e+37  ;;  %vm459_vm9 = vcmp.ge.f32.partialorder %v1057_v12, 0.0 }
 0x474   :  { %v465_v15 = vmul.f32 0.3275911, %v463_v13  ;;  %v517_v49 = vsub.f32 0.0, %v463_v13 }
 0x476   :  { %v790_v16 = vpop.eup %789  ;;  %v467_v18 = vadd.f32 1.0, %v465_v15  ;;  %v519_v54 = vmul.f32 %v517_v49, %v463_v13 }
 0x477   :  { %v469_v17 = vmul.f32 %v790_v16, %v466_v8  ;;  %vm474_vm15 = vweird.f32 %v790_v16  ;;  %v907_v8 = vmov -1.0  }
 0x478   :  { %791 = vrcp.f32 %v467_v18  ;;  %vm475_vm2 = vmor %vm473_vm1, %vm474_vm15  ;;  %v494_v36 = vand.u32 2147483648, %v467_v18  ;;  %v492_v38 = vand.u32 2147483647, %v467_v18  ;;  %vm488_vm5 = vweird.f32 %v467_v18 }
 0x479   :  { %v470_v20 = vsub.f32 1.0, %v469_v17  ;;  %793 = vpow2.f32 %v520_v47  ;;  %v522_v58 = vmul.f32 1.442695, %v519_v54  ;;  %v460_v11 = vsel %vm458_vm8, 1.0, %v907_v8 }
 0x47a   :  { %v495_v44 = vor.u32 1.1754944e-38, %v494_v36  ;;  %vm493_vm7 = vcmp.eq.f32.partialorder %v492_v38, 8.507059e+37 }
 0x47b   :  { %v471_v23 = vmul.f32 %v790_v16, %v470_v20  ;;  %795 = vpow2.f32 %v522_v58  ;;  %v455_v20 = vmul.f32 0.5, %v1051_v9 }
 0x47d   :  { %v472_v26 = vadd.f32 %v790_v16, %v471_v23 }
 0x47e   :  { %v792_v29 = vpop.eup %791 }
 0x47f   :  { %v476_v30 = vsel %vm475_vm2, %v790_v16, %v472_v26  ;;  %v484_v31 = vmul.f32 %v792_v29, %v467_v18  ;;  %vm489_vm4 = vweird.f32 %v792_v29  ;;  %v794_v60 = vpop.eup %793  ;;  %v461_v16 = vsel %vm459_vm9, 1.0, %v907_v8 }
 0x480   :  { %v481_v0 = vsel %vm478_vm3, %v480_v28, %v476_v30  ;;  %vm490_vm6 = vmor %vm488_vm5, %vm489_vm4 }
 0x481   :  { %v498_v33 = vmul.f32 1.0614054, %v481_v0  ;;  %v485_v35 = vsub.f32 1.0, %v484_v31  ;;  %v796_v7 = vpop.eup %795 }
 0x483   :  { %v500_v2 = vadd.f32 -1.4531521, %v498_v33  ;;  %v486_v37 = vmul.f32 %v792_v29, %v485_v35 }
 0x485   :  { %v502_v40 = vmul.f32 %v500_v2, %v481_v0  ;;  %v487_v42 = vadd.f32 %v792_v29, %v486_v37 }
 0x487   :  { %v504_v43 = vadd.f32 1.4214138, %v502_v40  ;;  %v491_v45 = vsel %vm490_vm6, %v792_v29, %v487_v42 }
 0x488   :  { %v496_v48 = vsel %vm493_vm7, %v495_v44, %v491_v45 }
 0x489   :  { %v506_v46 = vmul.f32 %v504_v43, %v481_v0  ;;  %v499_v50 = vmul.f32 1.0614054, %v496_v48 }
 0x48b   :  { %v508_v51 = vadd.f32 -0.28449672, %v506_v46  ;;  %v501_v52 = vadd.f32 -1.4531521, %v499_v50 }
 0x48d   :  { %v510_v53 = vmul.f32 %v508_v51, %v481_v0  ;;  %v503_v55 = vmul.f32 %v501_v52, %v496_v48 }
 0x48f   :  { %v512_v56 = vadd.f32 0.2548296, %v510_v53  ;;  %v505_v57 = vadd.f32 1.4214138, %v503_v55 }
 0x491   :  { %v514_v10 = vmul.f32 %v512_v56, %v481_v0  ;;  %v507_v59 = vmul.f32 %v505_v57, %v496_v48 }
 0x493   :  { %v524_v61 = vmul.f32 %v794_v60, %v514_v10  ;;  %v509_v62 = vadd.f32 -0.28449672, %v507_v59 }
 0x495   :  { %v511_v3 = vmul.f32 %v509_v62, %v496_v48  ;;  %v526_v4 = vsub.f32 1.0, %v524_v61 }
 0x497   :  { %v513_v5 = vadd.f32 0.2548296, %v511_v3  ;;  %v528_v13 = vmul.f32 %v526_v4, %v460_v11 }
 0x499   :  { %v515_v6 = vmul.f32 %v513_v5, %v496_v48  ;;  %v530_v17 = vadd.f32 1.0, %v528_v13 }
 0x49b   :  { %v525_v14 = vmul.f32 %v796_v7, %v515_v6  ;;  %v532_v1 = vmul.f32 %v530_v17, %v454_v19 }
 0x49d   :  { %v527_v15 = vsub.f32 1.0, %v525_v14 }
 0x49f   :  { %v529_v18 = vmul.f32 %v527_v15, %v461_v16 }
 0x4a1   :  { %v531_v22 = vadd.f32 1.0, %v529_v18 }
 0x4a3   :  { %v533_v23 = vmul.f32 %v531_v22, %v455_v20 }
 0x4a5   :  { %v534_v24 = vpack.c.bf16 %v533_v23, %v532_v1 }
 0x4a7   :  { %607 = vmatmul.bf16.vlgmr.msrb.gmra.mxu3 %v534_v24 }
 0x52a   :  { %v608_v25 = vpop.f32.mrf.mxu3 }
 0x52b   :  { %v613_v26 = vadd.f32 %v608_v25, %v1018_v21 }
 0x52d   :  { %615 = vst.msk [vmem:[#allocation8] sm:$0xff] %vm77_vm0, %v613_v26 }
 0x532   :  { %v610_v12 = vpop.f32.mrf.mxu3 }
 0x533   :  { %v614_v63 = vadd.f32 %v610_v12, %v1023_v27 }
 0x535   :  { %616 = vst.msk [vmem:[#allocation8 + $0x8] sm:$0xff] %vm77_vm0, %v614_v63 }
 0x536   :  { %629 = dma.vmem_to_hbm [thread:$0]  %s622_s27, 256, %s624_s30, [#allocation4], %s900_s9, %s900_s9, %s901_s10  }
 0x537   :  { %897 = dma.done.wait [#allocation4], 256  }
 0x538   :  { %898 = vsyncadd [#allocation4], 4294967040 }
 0x539   :  { %634 = vsyncpa [#allocation3], 1 }
 0x53a   :  { %635 = vsyncpa [#allocation6], 1 }
 0x53b   :  { %636 = vsyncpa [#allocation4], 1 }

</bundles_post_ra>
